<compile_context>
chip_gen: v6e
topology: v6e:2x2x1
jax: 0.10.0
libtpu: 0.0.40
codegen_flags: <defaults>
</compile_context>

<pallas_src>
import functools

import jax
import jax.numpy as jnp
from jax import lax
from jax.experimental import pallas as pl
from jax.experimental.pallas import tpu as pltpu


OUT_PAD = 128      # lane-dense padded width for the head output
NEG_BIG = -1e30    # bias for padded logit lanes -> softmax contribution 0
N_PROP_STEPS = 5   # GGNN propagation steps (matches GraphClsGGNN(..., 5, ...))


# ------------------------------ fused kernel ------------------------------

def _fused_kernel(ids_ref, embed_ref, w_nl_ref, b_nl_ref,
                  h0_ref, adj_ref, wp_ref, up_ref, wg_ref, wo_ref,
                  w2_nl_ref, w2_g_ref, b2_ref, o_ref):
    # ---- NL branch: token-count vector -> one matmul mean-pool -> linear ----
    seq_len = ids_ref.shape[0]
    vocab = embed_ref.shape[0]

    lane_v = lax.broadcasted_iota(jnp.int32, (1, vocab), 1)          # (1, V)

    def count_body(i, cnt):
        return cnt + (lane_v == ids_ref[i]).astype(jnp.float32)

    counts = lax.fori_loop(0, seq_len, count_body,
                           jnp.zeros((1, vocab), jnp.float32), unroll=True)
    pooled = jnp.dot(counts, embed_ref[...].astype(jnp.float32),
                     preferred_element_type=jnp.float32) * (1.0 / seq_len)
    nl_out = (jnp.dot(pooled, w_nl_ref[...],
                      preferred_element_type=jnp.float32)
              + b_nl_ref[...])                                        # (1, nl_od)

    # ---- fused two-branch GGNN (block-diagonal layout) ----
    h = h0_ref[...].astype(jnp.float32)        # (2N, 2D)
    a = adj_ref[...].astype(jnp.float32)       # (2N, 2N)
    wp = wp_ref[...]                           # (2D, 2D) block-diag
    up = up_ref[...]                           # (2D, 2D) block-diag

    def step(_, h):
        m = jnp.dot(a, h, preferred_element_type=jnp.float32)         # (2N, 2D)
        return jnp.tanh(
            jnp.dot(m, wp, preferred_element_type=jnp.float32)
            + jnp.dot(h, up, preferred_element_type=jnp.float32))     # (2N, 2D)

    h = lax.fori_loop(0, N_PROP_STEPS, step, h, unroll=True)

    # gated readout; cross-branch terms are sigmoid(0)*0 == 0 by construction
    gate = jax.nn.sigmoid(jnp.dot(h, wg_ref[...],
                                  preferred_element_type=jnp.float32))  # (2N, 2*GO)
    val = jnp.dot(h, wo_ref[...], preferred_element_type=jnp.float32)   # (2N, 2*GO)
    g_out = jnp.sum(gate * val, axis=0, keepdims=True)                  # (1, 2*GO)

    # ---- head: split-weight linear2 (avoids in-kernel concat) + softmax ----
    logits = (jnp.dot(nl_out, w2_nl_ref[...],
                      preferred_element_type=jnp.float32)
              + jnp.dot(g_out, w2_g_ref[...],
                        preferred_element_type=jnp.float32)
              + b2_ref[...])                                            # (1, OUT_PAD)
    m_max = jnp.max(logits, axis=-1, keepdims=True)
    e = jnp.exp(logits - m_max)
    o_ref[...] = e / jnp.sum(e, axis=-1, keepdims=True)


# ------------------------------ call wrapper ------------------------------

def _vmem():
    return pl.BlockSpec(memory_space=pltpu.MemorySpace.VMEM)


def _smem():
    return pl.BlockSpec(memory_space=pltpu.MemorySpace.SMEM)


def _block_diag(a, b):
    """[[a, 0], [0, b]]"""
    z_ab = jnp.zeros((a.shape[0], b.shape[1]), a.dtype)
    z_ba = jnp.zeros((b.shape[0], a.shape[1]), b.dtype)
    top = jnp.concatenate([a, z_ab], axis=1)
    bot = jnp.concatenate([z_ba, b], axis=1)
    return jnp.concatenate([top, bot], axis=0)


def prepare_fused_params(params):
    """One-time repacking of the per-branch params into the fused layout."""
    nl_od = params["w_nl"].shape[1]
    g1, g2 = params["ggnn1"], params["ggnn2"]

    wp_bd = _block_diag(g1["wp"], g2["wp"])              # (2D, 2D)
    up_bd = _block_diag(g1["up"], g2["up"])              # (2D, 2D)
    wg_bd = _block_diag(g1["wg"], g2["wg"])              # (2D, 2*GO)
    wo_bd = _block_diag(g1["wo"], g2["wo"])              # (2D, 2*GO)

    w2, b2 = params["w2"], params["b2"]
    out_d = w2.shape[1]
    pad = OUT_PAD - out_d
    w2_pad = jnp.pad(w2, ((0, 0), (0, pad)))             # zero weights for pad lanes
    b2_pad = jnp.pad(b2, ((0, 0), (0, pad)), constant_values=NEG_BIG)
    return {
        "embed": params["embed"],
        "w_nl": params["w_nl"],
        "b_nl": params["b_nl"],
        "wp": wp_bd,
        "up": up_bd,
        "wg": wg_bd,
        "wo": wo_bd,
        "w2_nl": w2_pad[:nl_od],                         # (nl_od, OUT_PAD)
        "w2_g": w2_pad[nl_od:],                          # (2*GO, OUT_PAD)
        "b2": b2_pad,                                    # (1, OUT_PAD)
    }


@functools.partial(jax.jit, static_argnames=("out_d",))
def nlpl_forward(fused, nl_input_ids, data, *, out_d):
    """data = ((node_feats0, adj0), (node_feats1, adj1))."""
    (x0, a0), (x1, a1) = data
    # block-diagonal stacking of the two independent graphs (exact zeros keep
    # the two branches decoupled through tanh / gated readout)
    h0_bd = _block_diag(x0, x1)      # (2N, 2D)
    adj_bd = _block_diag(a0, a1)     # (2N, 2N)

    out_pad = pl.pallas_call(
        _fused_kernel,
        out_shape=jax.ShapeDtypeStruct((1, OUT_PAD), jnp.float32),
        in_specs=[_smem()] + [_vmem()] * 12,
        out_specs=_vmem(),
    )(
        nl_input_ids.astype(jnp.int32),
        fused["embed"], fused["w_nl"], fused["b_nl"],
        h0_bd, adj_bd, fused["wp"], fused["up"], fused["wg"], fused["wo"],
        fused["w2_nl"], fused["w2_g"], fused["b2"],
    )

    # TODO(synk): self.dropout is referenced in forward() but never defined in
    # __init__; modeled as identity (eval-mode dropout).
    return out_pad[:, :out_d]        # softmax probs, padded lanes are exactly 0


# --------------------------- deterministic params ---------------------------

def init_params(key, *, vocab, hidden, nl_od, gnn_in_d, gnn_out_each, whole_out_d):
    ks = jax.random.split(key, 12)
    s = 0.1

    def rn(k, shape):
        return (s * jax.random.normal(k, shape)).astype(jnp.float32)

    def ggnn(k0, k1, k2, k3):
        return {
            "wp": rn(k0, (gnn_in_d, gnn_in_d)),
            "up": rn(k1, (gnn_in_d, gnn_in_d)),
            "wg": rn(k2, (gnn_in_d, gnn_out_each)),
            "wo": rn(k3, (gnn_in_d, gnn_out_each)),
        }

    in2 = nl_od + 2 * gnn_out_each  # = nl_od + gnn_ln_out_d
    return {
        "embed": rn(ks[0], (vocab, hidden)),
        "w_nl": rn(ks[1], (hidden, nl_od)),
        "b_nl": rn(ks[2], (1, nl_od)),
        "ggnn1": ggnn(ks[3], ks[4], ks[5], ks[6]),
        "ggnn2": ggnn(ks[7], ks[8], ks[9], ks[10]),
        "w2": rn(ks[11], (in2, whole_out_d)),
        "b2": jnp.zeros((1, whole_out_d), jnp.float32),
    }


# ----------------------------------- main -----------------------------------

if __name__ == "__main__":
    VOCAB, SEQ, HIDDEN = 50, 8, 32
    NL_OD = 16
    GNN_IN_D = 32
    GNN_OUT_EACH = 1          # gnn_ln_out_d = 2
    WHOLE_OUT_D = 10
    NUM_NODES = 8

    key = jax.random.PRNGKey(0)
    k_par, k_ids, k_x0, k_a0, k_x1, k_a1 = jax.random.split(key, 6)

    params = init_params(
        k_par, vocab=VOCAB, hidden=HIDDEN, nl_od=NL_OD,
        gnn_in_d=GNN_IN_D, gnn_out_each=GNN_OUT_EACH, whole_out_d=WHOLE_OUT_D,
    )
    fused = prepare_fused_params(params)

    nl_input_ids = jax.random.randint(k_ids, (SEQ,), 0, VOCAB)

    graph0 = (
        (0.1 * jax.random.normal(k_x0, (NUM_NODES, GNN_IN_D))).astype(jnp.float32),
        jax.random.bernoulli(k_a0, 0.4, (NUM_NODES, NUM_NODES)).astype(jnp.float32),
    )
    graph1 = (
        (0.1 * jax.random.normal(k_x1, (NUM_NODES, GNN_IN_D))).astype(jnp.float32),
        jax.random.bernoulli(k_a1, 0.4, (NUM_NODES, NUM_NODES)).astype(jnp.float32),
    )

    out = nlpl_forward(fused, nl_input_ids, (graph0, graph1), out_d=WHOLE_OUT_D)
    out = jax.block_until_ready(out)

    assert out.shape == (1, WHOLE_OUT_D)
    assert jnp.isfinite(out).all()
    # softmax rows sum to 1 (padded lanes contribute exactly 0)
    assert abs(float(jnp.sum(out)) - 1.0) < 1e-4

    print("KERNEL_OK")
</pallas_src>

<mosaic_0001>
module attributes {stable_mosaic.version = 11 : i64} {
  func.func @_fused_kernel(%arg0: memref<8xi32, #tpu.memory_space<smem>>, %arg1: memref<50x32xf32, #tpu.memory_space<vmem>>, %arg2: memref<32x16xf32, #tpu.memory_space<vmem>>, %arg3: memref<1x16xf32, #tpu.memory_space<vmem>>, %arg4: memref<16x64xf32, #tpu.memory_space<vmem>>, %arg5: memref<16x16xf32, #tpu.memory_space<vmem>>, %arg6: memref<64x64xf32, #tpu.memory_space<vmem>>, %arg7: memref<64x64xf32, #tpu.memory_space<vmem>>, %arg8: memref<64x2xf32, #tpu.memory_space<vmem>>, %arg9: memref<64x2xf32, #tpu.memory_space<vmem>>, %arg10: memref<16x128xf32, #tpu.memory_space<vmem>>, %arg11: memref<2x128xf32, #tpu.memory_space<vmem>>, %arg12: memref<1x128xf32, #tpu.memory_space<vmem>>, %arg13: memref<1x128xf32, #tpu.memory_space<vmem>>) attributes {dimension_semantics = [], scalar_prefetch = 0 : i64, scratch_operands = 0 : i64, tpu.core_type = #tpu.core_type<tc>} {
    %0 = tpu.iota {dimensions = array<i32: 1>} : vector<1x50xi32>
    %cst = arith.constant 0.000000e+00 : f32
    %1 = vector.broadcast %cst : f32 to vector<1x50xf32>
    %c0_i32 = arith.constant 0 : i32
    %2 = arith.index_cast %c0_i32 : i32 to index
    %3 = memref.load %arg0[%2] : memref<8xi32, #tpu.memory_space<smem>>
    %4 = vector.broadcast %3 : i32 to vector<1x50xi32>
    %5 = arith.cmpi eq, %0, %4 : vector<1x50xi32>
    %6 = arith.extui %5 : vector<1x50xi1> to vector<1x50xi32>
    %7 = arith.sitofp %6 : vector<1x50xi32> to vector<1x50xf32>
    %8 = arith.addf %1, %7 : vector<1x50xf32>
    %c1_i32 = arith.constant 1 : i32
    %9 = arith.index_cast %c1_i32 : i32 to index
    %10 = memref.load %arg0[%9] : memref<8xi32, #tpu.memory_space<smem>>
    %11 = vector.broadcast %10 : i32 to vector<1x50xi32>
    %12 = arith.cmpi eq, %0, %11 : vector<1x50xi32>
    %13 = arith.extui %12 : vector<1x50xi1> to vector<1x50xi32>
    %14 = arith.sitofp %13 : vector<1x50xi32> to vector<1x50xf32>
    %15 = arith.addf %8, %14 : vector<1x50xf32>
    %c2_i32 = arith.constant 2 : i32
    %16 = arith.index_cast %c2_i32 : i32 to index
    %17 = memref.load %arg0[%16] : memref<8xi32, #tpu.memory_space<smem>>
    %18 = vector.broadcast %17 : i32 to vector<1x50xi32>
    %19 = arith.cmpi eq, %0, %18 : vector<1x50xi32>
    %20 = arith.extui %19 : vector<1x50xi1> to vector<1x50xi32>
    %21 = arith.sitofp %20 : vector<1x50xi32> to vector<1x50xf32>
    %22 = arith.addf %15, %21 : vector<1x50xf32>
    %c3_i32 = arith.constant 3 : i32
    %23 = arith.index_cast %c3_i32 : i32 to index
    %24 = memref.load %arg0[%23] : memref<8xi32, #tpu.memory_space<smem>>
    %25 = vector.broadcast %24 : i32 to vector<1x50xi32>
    %26 = arith.cmpi eq, %0, %25 : vector<1x50xi32>
    %27 = arith.extui %26 : vector<1x50xi1> to vector<1x50xi32>
    %28 = arith.sitofp %27 : vector<1x50xi32> to vector<1x50xf32>
    %29 = arith.addf %22, %28 : vector<1x50xf32>
    %c4_i32 = arith.constant 4 : i32
    %30 = arith.index_cast %c4_i32 : i32 to index
    %31 = memref.load %arg0[%30] : memref<8xi32, #tpu.memory_space<smem>>
    %32 = vector.broadcast %31 : i32 to vector<1x50xi32>
    %33 = arith.cmpi eq, %0, %32 : vector<1x50xi32>
    %34 = arith.extui %33 : vector<1x50xi1> to vector<1x50xi32>
    %35 = arith.sitofp %34 : vector<1x50xi32> to vector<1x50xf32>
    %36 = arith.addf %29, %35 : vector<1x50xf32>
    %c5_i32 = arith.constant 5 : i32
    %37 = arith.index_cast %c5_i32 : i32 to index
    %38 = memref.load %arg0[%37] : memref<8xi32, #tpu.memory_space<smem>>
    %39 = vector.broadcast %38 : i32 to vector<1x50xi32>
    %40 = arith.cmpi eq, %0, %39 : vector<1x50xi32>
    %41 = arith.extui %40 : vector<1x50xi1> to vector<1x50xi32>
    %42 = arith.sitofp %41 : vector<1x50xi32> to vector<1x50xf32>
    %43 = arith.addf %36, %42 : vector<1x50xf32>
    %c6_i32 = arith.constant 6 : i32
    %44 = arith.index_cast %c6_i32 : i32 to index
    %45 = memref.load %arg0[%44] : memref<8xi32, #tpu.memory_space<smem>>
    %46 = vector.broadcast %45 : i32 to vector<1x50xi32>
    %47 = arith.cmpi eq, %0, %46 : vector<1x50xi32>
    %48 = arith.extui %47 : vector<1x50xi1> to vector<1x50xi32>
    %49 = arith.sitofp %48 : vector<1x50xi32> to vector<1x50xf32>
    %50 = arith.addf %43, %49 : vector<1x50xf32>
    %c7_i32 = arith.constant 7 : i32
    %51 = arith.index_cast %c7_i32 : i32 to index
    %52 = memref.load %arg0[%51] : memref<8xi32, #tpu.memory_space<smem>>
    %53 = vector.broadcast %52 : i32 to vector<1x50xi32>
    %54 = arith.cmpi eq, %0, %53 : vector<1x50xi32>
    %55 = arith.extui %54 : vector<1x50xi1> to vector<1x50xi32>
    %56 = arith.sitofp %55 : vector<1x50xi32> to vector<1x50xf32>
    %57 = arith.addf %50, %56 : vector<1x50xf32>
    %c8_i32 = arith.constant 8 : i32
    %c0 = arith.constant 0 : index
    %c0_0 = arith.constant 0 : index
    %58 = vector.load %arg1[%c0, %c0_0] : memref<50x32xf32, #tpu.memory_space<vmem>>, vector<50x32xf32>
    %cst_1 = arith.constant dense<0.000000e+00> : vector<1x32xf32>
    %59 = tpu.matmul %57, %58, %cst_1 {dimension_numbers = #tpu.dot_dimension_numbers<[1], [0], [0], [1], [0, 0, 1, 1], [], []>} : vector<1x50xf32>, vector<50x32xf32>, vector<1x32xf32> -> vector<1x32xf32>
    %cst_2 = arith.constant 1.250000e-01 : f32
    %60 = vector.broadcast %cst_2 : f32 to vector<1x32xf32>
    %61 = arith.mulf %59, %60 : vector<1x32xf32>
    %c0_3 = arith.constant 0 : index
    %c0_4 = arith.constant 0 : index
    %62 = vector.load %arg2[%c0_3, %c0_4] : memref<32x16xf32, #tpu.memory_space<vmem>>, vector<32x16xf32>
    %cst_5 = arith.constant dense<0.000000e+00> : vector<1x16xf32>
    %63 = tpu.matmul %61, %62, %cst_5 {dimension_numbers = #tpu.dot_dimension_numbers<[1], [0], [0], [1], [0, 0, 1, 1], [], []>} : vector<1x32xf32>, vector<32x16xf32>, vector<1x16xf32> -> vector<1x16xf32>
    %c0_6 = arith.constant 0 : index
    %c0_7 = arith.constant 0 : index
    %64 = vector.load %arg3[%c0_6, %c0_7] : memref<1x16xf32, #tpu.memory_space<vmem>>, vector<1x16xf32>
    %65 = arith.addf %63, %64 : vector<1x16xf32>
    %c0_8 = arith.constant 0 : index
    %c0_9 = arith.constant 0 : index
    %66 = vector.load %arg4[%c0_8, %c0_9] : memref<16x64xf32, #tpu.memory_space<vmem>>, vector<16x64xf32>
    %c0_10 = arith.constant 0 : index
    %c0_11 = arith.constant 0 : index
    %67 = vector.load %arg5[%c0_10, %c0_11] : memref<16x16xf32, #tpu.memory_space<vmem>>, vector<16x16xf32>
    %c0_12 = arith.constant 0 : index
    %c0_13 = arith.constant 0 : index
    %68 = vector.load %arg6[%c0_12, %c0_13] : memref<64x64xf32, #tpu.memory_space<vmem>>, vector<64x64xf32>
    %c0_14 = arith.constant 0 : index
    %c0_15 = arith.constant 0 : index
    %69 = vector.load %arg7[%c0_14, %c0_15] : memref<64x64xf32, #tpu.memory_space<vmem>>, vector<64x64xf32>
    %c0_i32_16 = arith.constant 0 : i32
    %cst_17 = arith.constant dense<0.000000e+00> : vector<16x64xf32>
    %70 = tpu.matmul %67, %66, %cst_17 {dimension_numbers = #tpu.dot_dimension_numbers<[1], [0], [0], [1], [0, 0, 1, 1], [], []>} : vector<16x16xf32>, vector<16x64xf32>, vector<16x64xf32> -> vector<16x64xf32>
    %cst_18 = arith.constant dense<0.000000e+00> : vector<16x64xf32>
    %71 = tpu.matmul %70, %68, %cst_18 {dimension_numbers = #tpu.dot_dimension_numbers<[1], [0], [0], [1], [0, 0, 1, 1], [], []>} : vector<16x64xf32>, vector<64x64xf32>, vector<16x64xf32> -> vector<16x64xf32>
    %cst_19 = arith.constant dense<0.000000e+00> : vector<16x64xf32>
    %72 = tpu.matmul %66, %69, %cst_19 {dimension_numbers = #tpu.dot_dimension_numbers<[1], [0], [0], [1], [0, 0, 1, 1], [], []>} : vector<16x64xf32>, vector<64x64xf32>, vector<16x64xf32> -> vector<16x64xf32>
    %73 = arith.addf %71, %72 : vector<16x64xf32>
    %74 = math.tanh %73 : vector<16x64xf32>
    %c1_i32_20 = arith.constant 1 : i32
    %cst_21 = arith.constant dense<0.000000e+00> : vector<16x64xf32>
    %75 = tpu.matmul %67, %74, %cst_21 {dimension_numbers = #tpu.dot_dimension_numbers<[1], [0], [0], [1], [0, 0, 1, 1], [], []>} : vector<16x16xf32>, vector<16x64xf32>, vector<16x64xf32> -> vector<16x64xf32>
    %cst_22 = arith.constant dense<0.000000e+00> : vector<16x64xf32>
    %76 = tpu.matmul %75, %68, %cst_22 {dimension_numbers = #tpu.dot_dimension_numbers<[1], [0], [0], [1], [0, 0, 1, 1], [], []>} : vector<16x64xf32>, vector<64x64xf32>, vector<16x64xf32> -> vector<16x64xf32>
    %cst_23 = arith.constant dense<0.000000e+00> : vector<16x64xf32>
    %77 = tpu.matmul %74, %69, %cst_23 {dimension_numbers = #tpu.dot_dimension_numbers<[1], [0], [0], [1], [0, 0, 1, 1], [], []>} : vector<16x64xf32>, vector<64x64xf32>, vector<16x64xf32> -> vector<16x64xf32>
    %78 = arith.addf %76, %77 : vector<16x64xf32>
    %79 = math.tanh %78 : vector<16x64xf32>
    %c2_i32_24 = arith.constant 2 : i32
    %cst_25 = arith.constant dense<0.000000e+00> : vector<16x64xf32>
    %80 = tpu.matmul %67, %79, %cst_25 {dimension_numbers = #tpu.dot_dimension_numbers<[1], [0], [0], [1], [0, 0, 1, 1], [], []>} : vector<16x16xf32>, vector<16x64xf32>, vector<16x64xf32> -> vector<16x64xf32>
    %cst_26 = arith.constant dense<0.000000e+00> : vector<16x64xf32>
    %81 = tpu.matmul %80, %68, %cst_26 {dimension_numbers = #tpu.dot_dimension_numbers<[1], [0], [0], [1], [0, 0, 1, 1], [], []>} : vector<16x64xf32>, vector<64x64xf32>, vector<16x64xf32> -> vector<16x64xf32>
    %cst_27 = arith.constant dense<0.000000e+00> : vector<16x64xf32>
    %82 = tpu.matmul %79, %69, %cst_27 {dimension_numbers = #tpu.dot_dimension_numbers<[1], [0], [0], [1], [0, 0, 1, 1], [], []>} : vector<16x64xf32>, vector<64x64xf32>, vector<16x64xf32> -> vector<16x64xf32>
    %83 = arith.addf %81, %82 : vector<16x64xf32>
    %84 = math.tanh %83 : vector<16x64xf32>
    %c3_i32_28 = arith.constant 3 : i32
    %cst_29 = arith.constant dense<0.000000e+00> : vector<16x64xf32>
    %85 = tpu.matmul %67, %84, %cst_29 {dimension_numbers = #tpu.dot_dimension_numbers<[1], [0], [0], [1], [0, 0, 1, 1], [], []>} : vector<16x16xf32>, vector<16x64xf32>, vector<16x64xf32> -> vector<16x64xf32>
    %cst_30 = arith.constant dense<0.000000e+00> : vector<16x64xf32>
    %86 = tpu.matmul %85, %68, %cst_30 {dimension_numbers = #tpu.dot_dimension_numbers<[1], [0], [0], [1], [0, 0, 1, 1], [], []>} : vector<16x64xf32>, vector<64x64xf32>, vector<16x64xf32> -> vector<16x64xf32>
    %cst_31 = arith.constant dense<0.000000e+00> : vector<16x64xf32>
    %87 = tpu.matmul %84, %69, %cst_31 {dimension_numbers = #tpu.dot_dimension_numbers<[1], [0], [0], [1], [0, 0, 1, 1], [], []>} : vector<16x64xf32>, vector<64x64xf32>, vector<16x64xf32> -> vector<16x64xf32>
    %88 = arith.addf %86, %87 : vector<16x64xf32>
    %89 = math.tanh %88 : vector<16x64xf32>
    %c4_i32_32 = arith.constant 4 : i32
    %cst_33 = arith.constant dense<0.000000e+00> : vector<16x64xf32>
    %90 = tpu.matmul %67, %89, %cst_33 {dimension_numbers = #tpu.dot_dimension_numbers<[1], [0], [0], [1], [0, 0, 1, 1], [], []>} : vector<16x16xf32>, vector<16x64xf32>, vector<16x64xf32> -> vector<16x64xf32>
    %cst_34 = arith.constant dense<0.000000e+00> : vector<16x64xf32>
    %91 = tpu.matmul %90, %68, %cst_34 {dimension_numbers = #tpu.dot_dimension_numbers<[1], [0], [0], [1], [0, 0, 1, 1], [], []>} : vector<16x64xf32>, vector<64x64xf32>, vector<16x64xf32> -> vector<16x64xf32>
    %cst_35 = arith.constant dense<0.000000e+00> : vector<16x64xf32>
    %92 = tpu.matmul %89, %69, %cst_35 {dimension_numbers = #tpu.dot_dimension_numbers<[1], [0], [0], [1], [0, 0, 1, 1], [], []>} : vector<16x64xf32>, vector<64x64xf32>, vector<16x64xf32> -> vector<16x64xf32>
    %93 = arith.addf %91, %92 : vector<16x64xf32>
    %94 = math.tanh %93 : vector<16x64xf32>
    %c0_36 = arith.constant 0 : index
    %c0_37 = arith.constant 0 : index
    %95 = vector.load %arg8[%c0_36, %c0_37] : memref<64x2xf32, #tpu.memory_space<vmem>>, vector<64x2xf32>
    %cst_38 = arith.constant dense<0.000000e+00> : vector<16x2xf32>
    %96 = tpu.matmul %94, %95, %cst_38 {dimension_numbers = #tpu.dot_dimension_numbers<[1], [0], [0], [1], [0, 0, 1, 1], [], []>} : vector<16x64xf32>, vector<64x2xf32>, vector<16x2xf32> -> vector<16x2xf32>
    %97 = arith.negf %96 : vector<16x2xf32>
    %98 = math.exp %97 : vector<16x2xf32>
    %cst_39 = arith.constant 1.000000e+00 : f32
    %99 = vector.broadcast %cst_39 : f32 to vector<16x2xf32>
    %100 = arith.addf %99, %98 : vector<16x2xf32>
    %101 = arith.divf %99, %100 : vector<16x2xf32>
    %c0_40 = arith.constant 0 : index
    %c0_41 = arith.constant 0 : index
    %102 = vector.load %arg9[%c0_40, %c0_41] : memref<64x2xf32, #tpu.memory_space<vmem>>, vector<64x2xf32>
    %cst_42 = arith.constant dense<0.000000e+00> : vector<16x2xf32>
    %103 = tpu.matmul %94, %102, %cst_42 {dimension_numbers = #tpu.dot_dimension_numbers<[1], [0], [0], [1], [0, 0, 1, 1], [], []>} : vector<16x64xf32>, vector<64x2xf32>, vector<16x2xf32> -> vector<16x2xf32>
    %104 = arith.mulf %101, %103 : vector<16x2xf32>
    %cst_43 = arith.constant dense<0.000000e+00> : vector<2xf32>
    %105 = vector.multi_reduction <add>, %104, %cst_43 [0] : vector<16x2xf32> to vector<2xf32>
    %106 = vector.shape_cast %105 : vector<2xf32> to vector<1x2xf32>
    %c0_44 = arith.constant 0 : index
    %c0_45 = arith.constant 0 : index
    %107 = vector.load %arg10[%c0_44, %c0_45] : memref<16x128xf32, #tpu.memory_space<vmem>>, vector<16x128xf32>
    %cst_46 = arith.constant dense<0.000000e+00> : vector<1x128xf32>
    %108 = tpu.matmul %65, %107, %cst_46 {dimension_numbers = #tpu.dot_dimension_numbers<[1], [0], [0], [1], [0, 0, 1, 1], [], []>} : vector<1x16xf32>, vector<16x128xf32>, vector<1x128xf32> -> vector<1x128xf32>
    %c0_47 = arith.constant 0 : index
    %c0_48 = arith.constant 0 : index
    %109 = vector.load %arg11[%c0_47, %c0_48] : memref<2x128xf32, #tpu.memory_space<vmem>>, vector<2x128xf32>
    %cst_49 = arith.constant dense<0.000000e+00> : vector<1x128xf32>
    %110 = tpu.matmul %106, %109, %cst_49 {dimension_numbers = #tpu.dot_dimension_numbers<[1], [0], [0], [1], [0, 0, 1, 1], [], []>} : vector<1x2xf32>, vector<2x128xf32>, vector<1x128xf32> -> vector<1x128xf32>
    %111 = arith.addf %108, %110 : vector<1x128xf32>
    %c0_50 = arith.constant 0 : index
    %c0_51 = arith.constant 0 : index
    %112 = vector.load %arg12[%c0_50, %c0_51] : memref<1x128xf32, #tpu.memory_space<vmem>>, vector<1x128xf32>
    %113 = arith.addf %111, %112 : vector<1x128xf32>
    %cst_52 = arith.constant dense<0xFF800000> : vector<1xf32>
    %114 = vector.multi_reduction <maximumf>, %113, %cst_52 [1] : vector<1x128xf32> to vector<1xf32>
    %115 = vector.shape_cast %114 : vector<1xf32> to vector<1x1xf32>
    %116 = vector.broadcast %115 : vector<1x1xf32> to vector<1x128xf32>
    %117 = arith.subf %113, %116 : vector<1x128xf32>
    %118 = math.exp %117 : vector<1x128xf32>
    %cst_53 = arith.constant dense<0.000000e+00> : vector<1xf32>
    %119 = vector.multi_reduction <add>, %118, %cst_53 [1] : vector<1x128xf32> to vector<1xf32>
    %120 = vector.shape_cast %119 : vector<1xf32> to vector<1x1xf32>
    %121 = vector.broadcast %120 : vector<1x1xf32> to vector<1x128xf32>
    %122 = arith.divf %118, %121 : vector<1x128xf32>
    %c0_54 = arith.constant 0 : index
    %c0_55 = arith.constant 0 : index
    %123 = vector.load %arg13[%c0_54, %c0_55] : memref<1x128xf32, #tpu.memory_space<vmem>>, vector<1x128xf32>
    tpu.vector_store %arg13[%c0_54, %c0_55], %122 {strides = array<i32>} : memref<1x128xf32, #tpu.memory_space<vmem>>, vector<1x128xf32>,
    return
  }
}

</mosaic_0001>

<bundles_post_ra>
// kernel: nlpl_forward.1
= control target key start
LH: loop header
LB: loop body
LE: loop exit
PB: predicated region body
PF: predicated region fallthrough
CT: control target
= control target key end

     0   :  { %18 = vsyncpa [#allocation4], 0  ;;  %s2996_s0 = inlined_call_operand.vmem [shape: s32[8], index: 0, kind: input, shape index: {}]   ;;  %s2997_s1 = inlined_call_operand.vmem [shape: f32[50,32], index: 1, kind: input, shape index: {}]   ;;  %s2998_s2 = inlined_call_operand.vmem [shape: f32[32,16], index: 2, kind: input, shape index: {}]   ;;  %s2999_s3 = inlined_call_operand.vmem [shape: f32[1,16], index: 3, kind: input, shape index: {}]   ;;  %s3000_s4 = inlined_call_operand.vmem [shape: f32[16,64], index: 4, kind: input, shape index: {}]   ;;  %s3001_s5 = inlined_call_operand.vmem [shape: f32[16,16], index: 5, kind: input, shape index: {}]   ;;  %s3002_s6 = inlined_call_operand.vmem [shape: f32[64,64], index: 6, kind: input, shape index: {}]   ;;  %s3003_s7 = inlined_call_operand.vmem [shape: f32[64,64], index: 7, kind: input, shape index: {}]   ;;  %s3004_s8 = inlined_call_operand.vmem [shape: f32[64,2], index: 8, kind: input, shape index: {}]   ;;  %s3005_s9 = inlined_call_operand.vmem [shape: f32[64,2], index: 9, kind: input, shape index: {}]   ;;  %s3006_s10 = inlined_call_operand.vmem [shape: f32[16,128], index: 10, kind: input, shape index: {}]   ;;  %s3007_s11 = inlined_call_operand.vmem [shape: f32[2,128], index: 11, kind: input, shape index: {}]   ;;  %s3008_s12 = inlined_call_operand.vmem [shape: f32[1,128], index: 12, kind: input, shape index: {}]   ;;  %s3009_s13 = inlined_call_operand.hbm [shape: f32[1,128], index: 13, kind: output, shape index: {}]  }
   0x1   :  { %19 = vsyncpa [#allocation3], 0  ;;  %s26_s27 = sshll.u32 %s2996_s0, 4  ;;  %s27_s27 = int_to_ptr.vmem [resolvable:$true] %s26_s27 }
   0x2   :  { %s2428_s28 = scalar_lea.vmem %s27_s27, 16  ;;  %p2433_p1 = scmp.lt.s32.totalorder %s27_s27, %s27_s27 }
   0x3   :  { %p2429_p0 = scmp.ne.s32.totalorder %s27_s27, %s2428_s28  ;;  %p2434_p2 = scmp.lt.s32.totalorder %s2428_s28, %s2428_s28 }
   0x5   :  { %p2435_p3 = por %p2434_p2, %p2433_p1 }
   0x7   :  { %p2436_p4 = pnand %p2435_p3, %p2429_p0 }
   0x9   :  { %2439 = shalt.err (!%p2436_p4)
}
   0xa   :  { %s2464_s29 = smov [#allocation2]  }
   0xb   :  { %29 = dma.vmem_to_smem %s27_s27, 16, %s2464_s29, [#allocation4]  }
   0xc   :  { %2460 = dma.done.wait [#allocation4], 16  }
   0xd   :  { %2461 = vsyncadd [#allocation4], 4294967280 }
   0xe   :  { %57 = sfence }
   0xf   :  { %v114_v0 = vld [vmem:[%s2997_s1 + $0x30] sm:$0x3]  ;;  %vm119_vm0 = vcmask 1041408   ;;  %v58_v1 = vlaneseq  ;;  %v2465_v2 = vmov 0.0   ;;  %v113_v3 = vld [vmem:[%s2997_s1 + $0x28] sm:$0xff]  ;;  %s60_s16 = sld [smem:[#allocation2]] }
  0x10   :  { %2089 = vmatprep.subr.mxu0 %v2465_v2  ;;  %2106 = vmatprep.subr.mxu1 %v2465_v2  ;;  %vm2466_vm1 = vmmov 0   ;;  %s1875_s17 = sld [smem:[#allocation2 + $0x1]]  ;;  %v197_v4 = vld [vmem:[%s2998_s2 + $0x18] sm:$0xff]  ;;  %v112_v5 = vld [vmem:[%s2997_s1 + $0x20] sm:$0xff]  ;;  %v196_v6 = vld [vmem:[%s2998_s2 + $0x10] sm:$0xff]  ;;  %vm115_vm10 = vcmask 408576  }
  0x11   :  { %2090 = vmatpush3.msk.msra.mxu0 %vm119_vm0, %v114_v0  ;;  %2103 = vmatprep.mubr.msk.f32.mxu0 %vm2466_vm1, %v2465_v2  ;;  %s1877_s22 = sld [smem:[#allocation2 + $0x2]]  ;;  %v59_v7 = vand.u32 127, %v58_v1  ;;  %v111_v8 = vld [vmem:[%s2997_s1 + $0x18] sm:$0xff]  ;;  %v110_v9 = vld [vmem:[%s2997_s1 + $0x10] sm:$0xff]  ;;  %v109_v12 = vld [vmem:[%s2997_s1 + $0x8] sm:$0xff]  ;;  %vm199_vm11 = vcmask 261120  }
  0x12   :  { %2091 = vmatprep.subr.mxu0 %v2465_v2  ;;  %2107 = vmatpush3.msra.mxu1 %v197_v4  ;;  %s2562_s25 = sld [smem:[#allocation2 + $0x3]]  ;;  %v108_v17 = vld [vmem:[%s2997_s1] sm:$0xff]  ;;  %v195_v35 = vld [vmem:[%s2998_s2 + $0x8] sm:$0xff]  ;;  %v2622_v38 = vld [vmem:[%s3002_s6 + $0x38] sm:$0xff]  ;;  %vm293_vm12 = vcmask 130048   ;;  %vm375_vm13 = vcmask 523264  }
  0x13   :  { %2092 = vmatpush3.msra.mxu0 %v113_v3  ;;  %2108 = vmatprep.subr.mxu1 %v2465_v2  ;;  %s2569_s28 = sld [smem:[#allocation2 + $0x4]]  ;;  %v194_v36 = vld [vmem:[%s2998_s2] sm:$0xff]  ;;  %v2616_v37 = vld [vmem:[%s3000_s4 + $0x8] sm:$0xff]  ;;  %v2629_v39 = vld [vmem:[%s3002_s6 + $0x30] sm:$0xff]  ;;  %vm1682_vm14 = vcmask 15360   ;;  %vm1846_vm15 = vcmask 1040384  }
  0x14   :  { %2093 = vmatprep.subr.mxu0 %v2465_v2  ;;  %2109 = vmatpush3.msra.mxu1 %v196_v6  ;;  %s2571_s29 = sld [smem:[#allocation2 + $0x5]]  ;;  %v2636_v40 = vld [vmem:[%s3002_s6 + $0x28] sm:$0xff]  ;;  %v2643_v41 = vld [vmem:[%s3002_s6 + $0x20] sm:$0xff]  ;;  %v2666_v48 = vld [vmem:[%s3003_s7 + $0x38] sm:$0xff] }
  0x15   :  { %2094 = vmatpush3.msra.mxu0 %v112_v5  ;;  %2110 = vmatprep.subr.mxu1 %v2465_v2  ;;  %v61_v10 = vstv %s60_s16  ;;  %s2578_s0 = sld [smem:[#allocation2 + $0x6]]  ;;  %v2650_v44 = vld [vmem:[%s3001_s5] sm:$0xff]  ;;  %v2661_v47 = vld [vmem:[%s3001_s5 + $0x8] sm:$0xff]  ;;  %v2671_v49 = vld [vmem:[%s3003_s7 + $0x30] sm:$0xff] }
  0x16   :  { %2095 = vmatprep.subr.mxu0 %v2465_v2  ;;  %2114 = vmatprep.mubr.msk.f32.mxu1 %vm2466_vm1, %v2465_v2  ;;  %vm62_vm2 = vcmp.eq.s32.totalorder %v59_v7, %v61_v10  ;;  %v67_v11 = vstv %s1875_s17  ;;  %s2582_s15 = sld [smem:[#allocation2 + $0x7]]  ;;  %v273_v46 = vld [vmem:[%s3000_s4] sm:$0xff]  ;;  %v2680_v50 = vld [vmem:[%s3003_s7 + $0x28] sm:$0xff]  ;;  %v2694_v52 = vld [vmem:[%s3003_s7 + $0x18] sm:$0xff] }
  0x17   :  { %2096 = vmatpush3.msra.mxu0 %v111_v8  ;;  %v1874_v13 = vsel %vm62_vm2, 1.0, %v2465_v2  ;;  %vm68_vm3 = vcmp.eq.s32.totalorder %v59_v7, %v67_v11  ;;  %v73_v14 = vstv %s1877_s22  ;;  %2111 = vmatpush3.msra.mxu1 %v195_v35  ;;  %v2687_v51 = vld [vmem:[%s3003_s7 + $0x20] sm:$0xff]  ;;  %v2703_v53 = vld [vmem:[%s3003_s7 + $0x10] sm:$0xff]  ;;  %v2708_v54 = vld [vmem:[%s3002_s6 + $0x18] sm:$0xff] }
  0x18   :  { %2097 = vmatprep.subr.mxu0 %v2465_v2  ;;  %v1876_v15 = vsel %vm68_vm3, 1.0, %v2465_v2  ;;  %vm74_vm4 = vcmp.eq.s32.totalorder %v59_v7, %v73_v14  ;;  %v79_v16 = vstv %s2562_s25  ;;  %2112 = vmatprep.subr.mxu1 %v2465_v2  ;;  %v2717_v55 = vld [vmem:[%s3003_s7 + $0x8] sm:$0xff]  ;;  %v2722_v56 = vld [vmem:[%s3002_s6 + $0x10] sm:$0xff]  ;;  %v2731_v57 = vld [vmem:[%s3003_s7] sm:$0xff] }
  0x19   :  { %2098 = vmatpush3.msra.mxu0 %v110_v9  ;;  %v71_v18 = vadd.f32 %v1876_v15, %v1874_v13  ;;  %v1878_v19 = vsel %vm74_vm4, 1.0, %v2465_v2  ;;  %vm80_vm5 = vcmp.eq.s32.totalorder %v59_v7, %v79_v16  ;;  %v85_v20 = vstv %s2569_s28  ;;  %2113 = vmatpush3.msra.mxu1 %v194_v36  ;;  %v2736_v58 = vld [vmem:[%s3002_s6 + $0x8] sm:$0xff]  ;;  %v2745_v59 = vld [vmem:[%s3002_s6] sm:$0xff] }
  0x1a   :  { %2099 = vmatprep.subr.mxu0 %v2465_v2  ;;  %v1880_v21 = vsel %vm80_vm5, 1.0, %v2465_v2  ;;  %vm86_vm6 = vcmp.eq.s32.totalorder %v59_v7, %v85_v20  ;;  %v91_v22 = vstv %s2571_s29  ;;  %2117 = vmatprep.subr.mxu1 %v2616_v37  ;;  %s2467_s29 = smov [#allocation5]  }
  0x1b   :  { %2100 = vmatpush3.msra.mxu0 %v109_v12  ;;  %v77_v23 = vadd.f32 %v1878_v19, %v71_v18  ;;  %vm92_vm7 = vcmp.eq.s32.totalorder %v59_v7, %v91_v22  ;;  %v97_v24 = vstv %s2578_s0  ;;  %v1882_v25 = vsel %vm86_vm6, 1.0, %v2465_v2  ;;  %s1865_s30 = sshll.u32 %s2467_s29, 4  ;;  %s1866_s30 = int_to_ptr.vmem [resolvable:$true] %s1865_s30 }
  0x1c   :  { %2101 = vmatprep.subr.mxu0 %v2465_v2  ;;  %v103_v26 = vstv %s2582_s15  ;;  %vm98_vm8 = vcmp.eq.s32.totalorder %v59_v7, %v97_v24  ;;  %v1884_v28 = vsel %vm92_vm7, 1.0, %v2465_v2  ;;  %s2444_s14 = scalar_lea.vmem %s1866_s30, 32  ;;  %p2445_p6 = scmp.lt.s32.totalorder %s1866_s30, %s1866_s30 }
  0x1d   :  { %2102 = vmatpush3.msra.mxu0 %v108_v17  ;;  %v83_v27 = vadd.f32 %v1880_v21, %v77_v23  ;;  %vm104_vm9 = vcmp.eq.s32.totalorder %v59_v7, %v103_v26  ;;  %v1886_v30 = vsel %vm98_vm8, 1.0, %v2465_v2 }
  0x1e   :  { %v1888_v32 = vsel %vm104_vm9, 1.0, %v2465_v2  ;;  %2143 = vmatprep.subr.mxu0 %v2622_v38 }
  0x1f   :  { %v89_v29 = vadd.f32 %v1882_v25, %v83_v27 }
  0x21   :  { %v95_v31 = vadd.f32 %v1884_v28, %v89_v29 }
  0x23   :  { %v101_v33 = vadd.f32 %v1886_v30, %v95_v31 }
  0x25   :  { %v107_v34 = vadd.f32 %v1888_v32, %v101_v33 }
  0x27   :  { %2104 = vmatmul.mubr.msk.f32.vlgmr.msra.gmra.mxu0 %vm115_vm10, %v107_v34 }
  0x28   :  { %2144 = vmatpush3.msra.mxu0 %v2622_v38 }
  0x29   :  { %2145 = vmatprep.subr.mxu0 %v2629_v39 }
  0x2a   :  { %2146 = vmatpush3.msra.mxu0 %v2629_v39 }
  0x2b   :  { %2147 = vmatprep.subr.mxu0 %v2636_v40 }
  0x2c   :  { %2148 = vmatpush3.msra.mxu0 %v2636_v40 }
  0x2d   :  { %2149 = vmatprep.subr.mxu0 %v2643_v41 }
  0x2e   :  { %2150 = vmatpush3.msra.mxu0 %v2643_v41 }
  0x2f   :  { %2151 = vmatprep.subr.mxu0 %v2708_v54 }
  0x30   :  { %2152 = vmatpush3.msra.mxu0 %v2708_v54 }
  0x31   :  { %2153 = vmatprep.subr.mxu0 %v2722_v56 }
  0x32   :  { %2154 = vmatpush3.msra.mxu0 %v2722_v56 }
  0x33   :  { %2155 = vmatprep.subr.mxu0 %v2736_v58 }
  0x34   :  { %2156 = vmatpush3.msra.mxu0 %v2736_v58 }
  0x35   :  { %2157 = vmatprep.subr.mxu0 %v2745_v59 }
  0x36   :  { %2158 = vmatpush3.msra.mxu0 %v2745_v59 }
  0x37   :  { %2169 = vmatprep.subr.mxu0 %v2666_v48 }
  0xe7   :  { %v189_v42 = vpop.f32.mrf.mxu0 }
  0xe8   :  { %v193_v43 = vmul.f32 0.125, %v189_v42 }
  0xe9   :  { %v2105_v45 = vpop.f32.mrf.mxu0 }
  0xea   :  { %2115 = vmatmul.mubr.msk.f32.vlgmr.msra.gmra.mxu1 %vm199_vm11, %v193_v43  ;;  %v1502_v43 = vld [vmem:[%s3004_s8 + $0x30] sm:$0xff]  ;;  %v1501_v45 = vld [vmem:[%s3004_s8 + $0x28] sm:$0xff] }
  0xeb   :  { %2118 = vmatpush3.msra.mxu1 %v2616_v37  ;;  %2121 = vmatprep.mubr.msk.f32.mxu1 %vm293_vm12, %v2650_v44 }
  0xec   :  { %2119 = vmatprep.subr.mxu1 %v273_v46 }
  0xed   :  { %2120 = vmatpush3.msra.mxu1 %v273_v46 }
  0xee   :  { %2122 = vmatmul.mubr.msk.f32.vlgmr.msra.gmra.mxu1 %vm293_vm12, %v2661_v47  ;;  %2124 = vmatprep.subr.mxu1 %v2666_v48 }
  0xef   :  { %2125 = vmatpush3.msra.mxu1 %v2666_v48  ;;  %2140 = vmatprep.mubr.msk.f32.mxu1 %vm375_vm13, %v273_v46  ;;  %v1602_v46 = vld [vmem:[%s3005_s9 + $0x28] sm:$0xff] }
  0xf0   :  { %2126 = vmatprep.subr.mxu1 %v2671_v49 }
  0xf1   :  { %2127 = vmatpush3.msra.mxu1 %v2671_v49 }
  0xf2   :  { %2128 = vmatprep.subr.mxu1 %v2680_v50 }
  0xf3   :  { %2129 = vmatpush3.msra.mxu1 %v2680_v50 }
  0xf4   :  { %2130 = vmatprep.subr.mxu1 %v2687_v51 }
  0xf5   :  { %2131 = vmatpush3.msra.mxu1 %v2687_v51 }
  0xf6   :  { %2132 = vmatprep.subr.mxu1 %v2694_v52 }
  0xf7   :  { %2133 = vmatpush3.msra.mxu1 %v2694_v52 }
  0xf8   :  { %2134 = vmatprep.subr.mxu1 %v2703_v53 }
  0xf9   :  { %2135 = vmatpush3.msra.mxu1 %v2703_v53 }
  0xfa   :  { %2136 = vmatprep.subr.mxu1 %v2717_v55 }
  0xfb   :  { %2137 = vmatpush3.msra.mxu1 %v2717_v55 }
  0xfc   :  { %2138 = vmatprep.subr.mxu1 %v2731_v57 }
  0xfd   :  { %2139 = vmatpush3.msra.mxu1 %v2731_v57 }
  0xfe   :  { %2141 = vmatmul.mubr.msk.f32.vlgmr.msra.gmra.mxu1 %vm375_vm13, %v2616_v37 }
  0xff   :  { %2166 = vmatprep.mubr.msk.f32.mxu1 %vm293_vm12, %v2650_v44 }
 0x1aa   :  { %v2755_v60 = vpop.f32.mrf.mxu1 }
 0x1ac   :  { %v2116_v61 = vpop.f32.mrf.mxu1 }
 0x1ae   :  { %v2123_v62 = vpop.f32.mrf.mxu1 }
 0x1b0   :  { %v366_v63 = vpop.f32.mrf.mxu1 }
 0x1b1   :  { %2159 = vmatprep.mubr.msk.f32.mxu0 %vm375_vm13, %v366_v63 }
 0x1b2   :  { %2160 = vmatmul.mubr.msk.f32.vlgmr.msra.gmra.mxu0 %vm375_vm13, %v2123_v62 }
 0x1b3   :  { %2170 = vmatpush3.msra.mxu0 %v2666_v48 }
 0x1b4   :  { %2171 = vmatprep.subr.mxu0 %v2671_v49 }
 0x1b5   :  { %2172 = vmatpush3.msra.mxu0 %v2671_v49 }
 0x1b6   :  { %2173 = vmatprep.subr.mxu0 %v2680_v50 }
 0x1b7   :  { %2174 = vmatpush3.msra.mxu0 %v2680_v50 }
 0x1b8   :  { %2175 = vmatprep.subr.mxu0 %v2687_v51 }
 0x1b9   :  { %2176 = vmatpush3.msra.mxu0 %v2687_v51 }
 0x1ba   :  { %2177 = vmatprep.subr.mxu0 %v2694_v52 }
 0x1bb   :  { %2178 = vmatpush3.msra.mxu0 %v2694_v52 }
 0x1bc   :  { %2179 = vmatprep.subr.mxu0 %v2703_v53 }
 0x1bd   :  { %2180 = vmatpush3.msra.mxu0 %v2703_v53 }
 0x1be   :  { %2181 = vmatprep.subr.mxu0 %v2717_v55  ;;  %v2142_v0 = vpop.f32.mrf.mxu1 }
 0x1bf   :  { %2182 = vmatpush3.msra.mxu0 %v2717_v55 }
 0x1c0   :  { %2183 = vmatprep.subr.mxu0 %v2731_v57  ;;  %v448_v4 = vpop.f32.mrf.mxu1 }
 0x1c1   :  { %2184 = vmatpush3.msra.mxu0 %v2731_v57 }
 0x272   :  { %v2161_v1 = vpop.f32.mrf.mxu0 }
 0x273   :  { %v535_v3 = vadd.f32 %v2161_v1, %v2142_v0  ;;  %v1693_v1 = vld [vmem:[%s3006_s10 + $0x8] sm:$0xff] }
 0x274   :  { %v529_v5 = vpop.f32.mrf.mxu0 }
 0x275   :  { %2396 = vtanh.f32 %v535_v3  ;;  %v530_v6 = vadd.f32 %v529_v5, %v448_v4  ;;  %v198_v4 = vld [vmem:[%s2999_s3] sm:$0x1] }
 0x276   :  { %v1692_v5 = vld [vmem:[%s3006_s10] sm:$0xff] }
 0x277   :  { %2398 = vtanh.f32 %v530_v6  ;;  %v270_v6 = vadd.f32 %v2755_v60, %v198_v4 }
 0x282   :  { %v2397_v7 = vpop.eup %2396 }
 0x283   :  { %2162 = vmatprep.subr.mxu1 %v2397_v7 }
 0x284   :  { %v2399_v8 = vpop.eup %2398  ;;  %2163 = vmatpush3.msra.mxu1 %v2397_v7 }
 0x285   :  { %2164 = vmatprep.subr.mxu1 %v2399_v8  ;;  %2185 = vmatprep.mubr.msk.f32.mxu0 %vm375_vm13, %v2399_v8 }
 0x286   :  { %2165 = vmatpush3.msra.mxu1 %v2399_v8  ;;  %2186 = vmatmul.mubr.msk.f32.vlgmr.msra.gmra.mxu0 %vm375_vm13, %v2397_v7  ;;  %v1694_v7 = vld [vmem:[%s3007_s11] sm:$0x3] }
 0x287   :  { %2167 = vmatmul.mubr.msk.f32.vlgmr.msra.gmra.mxu1 %vm293_vm12, %v2661_v47  ;;  %2188 = vmatprep.subr.mxu1 %v2622_v38 }
 0x288   :  { %2189 = vmatpush3.msra.mxu1 %v2622_v38  ;;  %2211 = vmatprep.mubr.msk.f32.mxu0 %vm293_vm12, %v2650_v44 }
 0x289   :  { %2190 = vmatprep.subr.mxu1 %v2629_v39 }
 0x28a   :  { %2191 = vmatpush3.msra.mxu1 %v2629_v39 }
 0x28b   :  { %2192 = vmatprep.subr.mxu1 %v2636_v40 }
 0x28c   :  { %2193 = vmatpush3.msra.mxu1 %v2636_v40 }
 0x28d   :  { %2194 = vmatprep.subr.mxu1 %v2643_v41 }
 0x28e   :  { %2195 = vmatpush3.msra.mxu1 %v2643_v41 }
 0x28f   :  { %2196 = vmatprep.subr.mxu1 %v2708_v54 }
 0x290   :  { %2197 = vmatpush3.msra.mxu1 %v2708_v54 }
 0x291   :  { %2198 = vmatprep.subr.mxu1 %v2722_v56 }
 0x292   :  { %2199 = vmatpush3.msra.mxu1 %v2722_v56 }
 0x293   :  { %2200 = vmatprep.subr.mxu1 %v2736_v58 }
 0x294   :  { %2201 = vmatpush3.msra.mxu1 %v2736_v58 }
 0x295   :  { %2202 = vmatprep.subr.mxu1 %v2745_v59 }
 0x296   :  { %2203 = vmatpush3.msra.mxu1 %v2745_v59 }
 0x297   :  { %2214 = vmatprep.subr.mxu1 %v2666_v48 }
 0x346   :  { %v2187_v11 = vpop.f32.mrf.mxu0 }
 0x347   :  { %v2168_v9 = vpop.f32.mrf.mxu1 }
 0x348   :  { %v687_v14 = vpop.f32.mrf.mxu0 }
 0x349   :  { %v606_v10 = vpop.f32.mrf.mxu1 }
 0x34a   :  { %2204 = vmatprep.mubr.msk.f32.mxu1 %vm375_vm13, %v606_v10 }
 0x34b   :  { %2205 = vmatmul.mubr.msk.f32.vlgmr.msra.gmra.mxu1 %vm375_vm13, %v2168_v9 }
 0x34c   :  { %2215 = vmatpush3.msra.mxu1 %v2666_v48 }
 0x34d   :  { %2216 = vmatprep.subr.mxu1 %v2671_v49 }
 0x34e   :  { %2217 = vmatpush3.msra.mxu1 %v2671_v49 }
 0x34f   :  { %2218 = vmatprep.subr.mxu1 %v2680_v50 }
 0x350   :  { %2219 = vmatpush3.msra.mxu1 %v2680_v50 }
 0x351   :  { %2220 = vmatprep.subr.mxu1 %v2687_v51 }
 0x352   :  { %2221 = vmatpush3.msra.mxu1 %v2687_v51 }
 0x353   :  { %2222 = vmatprep.subr.mxu1 %v2694_v52 }
 0x354   :  { %2223 = vmatpush3.msra.mxu1 %v2694_v52 }
 0x355   :  { %2224 = vmatprep.subr.mxu1 %v2703_v53 }
 0x356   :  { %2225 = vmatpush3.msra.mxu1 %v2703_v53 }
 0x357   :  { %2226 = vmatprep.subr.mxu1 %v2717_v55 }
 0x358   :  { %2227 = vmatpush3.msra.mxu1 %v2717_v55 }
 0x359   :  { %2228 = vmatprep.subr.mxu1 %v2731_v57 }
 0x35a   :  { %2229 = vmatpush3.msra.mxu1 %v2731_v57 }
 0x40b   :  { %v2206_v12 = vpop.f32.mrf.mxu1 }
 0x40c   :  { %v774_v13 = vadd.f32 %v2206_v12, %v2187_v11 }
 0x40d   :  { %v768_v15 = vpop.f32.mrf.mxu1 }
 0x40e   :  { %2400 = vtanh.f32 %v774_v13  ;;  %v769_v16 = vadd.f32 %v768_v15, %v687_v14 }
 0x410   :  { %2402 = vtanh.f32 %v769_v16 }
 0x41b   :  { %v2401_v17 = vpop.eup %2400 }
 0x41c   :  { %2207 = vmatprep.subr.mxu0 %v2401_v17 }
 0x41d   :  { %v2403_v18 = vpop.eup %2402  ;;  %2208 = vmatpush3.msra.mxu0 %v2401_v17 }
 0x41e   :  { %2209 = vmatprep.subr.mxu0 %v2403_v18  ;;  %2230 = vmatprep.mubr.msk.f32.mxu1 %vm375_vm13, %v2403_v18 }
 0x41f   :  { %2210 = vmatpush3.msra.mxu0 %v2403_v18  ;;  %2231 = vmatmul.mubr.msk.f32.vlgmr.msra.gmra.mxu1 %vm375_vm13, %v2401_v17 }
 0x420   :  { %2212 = vmatmul.mubr.msk.f32.vlgmr.msra.gmra.mxu0 %vm293_vm12, %v2661_v47  ;;  %2233 = vmatprep.subr.mxu0 %v2622_v38 }
 0x421   :  { %2234 = vmatpush3.msra.mxu0 %v2622_v38  ;;  %2256 = vmatprep.mubr.msk.f32.mxu1 %vm293_vm12, %v2650_v44 }
 0x422   :  { %2235 = vmatprep.subr.mxu0 %v2629_v39 }
 0x423   :  { %2236 = vmatpush3.msra.mxu0 %v2629_v39 }
 0x424   :  { %2237 = vmatprep.subr.mxu0 %v2636_v40 }
 0x425   :  { %2238 = vmatpush3.msra.mxu0 %v2636_v40 }
 0x426   :  { %2239 = vmatprep.subr.mxu0 %v2643_v41 }
 0x427   :  { %2240 = vmatpush3.msra.mxu0 %v2643_v41 }
 0x428   :  { %2241 = vmatprep.subr.mxu0 %v2708_v54 }
 0x429   :  { %2242 = vmatpush3.msra.mxu0 %v2708_v54 }
 0x42a   :  { %2243 = vmatprep.subr.mxu0 %v2722_v56 }
 0x42b   :  { %2244 = vmatpush3.msra.mxu0 %v2722_v56 }
 0x42c   :  { %2245 = vmatprep.subr.mxu0 %v2736_v58 }
 0x42d   :  { %2246 = vmatpush3.msra.mxu0 %v2736_v58 }
 0x42e   :  { %2247 = vmatprep.subr.mxu0 %v2745_v59 }
 0x42f   :  { %2248 = vmatpush3.msra.mxu0 %v2745_v59 }
 0x430   :  { %2259 = vmatprep.subr.mxu0 %v2666_v48 }
 0x4df   :  { %v2232_v21 = vpop.f32.mrf.mxu1 }
 0x4e0   :  { %v2213_v19 = vpop.f32.mrf.mxu0 }
 0x4e1   :  { %v926_v24 = vpop.f32.mrf.mxu1 }
 0x4e2   :  { %v845_v20 = vpop.f32.mrf.mxu0 }
 0x4e3   :  { %2249 = vmatprep.mubr.msk.f32.mxu0 %vm375_vm13, %v845_v20 }
 0x4e4   :  { %2250 = vmatmul.mubr.msk.f32.vlgmr.msra.gmra.mxu0 %vm375_vm13, %v2213_v19 }
 0x4e5   :  { %2260 = vmatpush3.msra.mxu0 %v2666_v48 }
 0x4e6   :  { %2261 = vmatprep.subr.mxu0 %v2671_v49 }
 0x4e7   :  { %2262 = vmatpush3.msra.mxu0 %v2671_v49 }
 0x4e8   :  { %2263 = vmatprep.subr.mxu0 %v2680_v50 }
 0x4e9   :  { %2264 = vmatpush3.msra.mxu0 %v2680_v50 }
 0x4ea   :  { %2265 = vmatprep.subr.mxu0 %v2687_v51 }
 0x4eb   :  { %2266 = vmatpush3.msra.mxu0 %v2687_v51 }
 0x4ec   :  { %2267 = vmatprep.subr.mxu0 %v2694_v52 }
 0x4ed   :  { %2268 = vmatpush3.msra.mxu0 %v2694_v52 }
 0x4ee   :  { %2269 = vmatprep.subr.mxu0 %v2703_v53 }
 0x4ef   :  { %2270 = vmatpush3.msra.mxu0 %v2703_v53 }
 0x4f0   :  { %2271 = vmatprep.subr.mxu0 %v2717_v55 }
 0x4f1   :  { %2272 = vmatpush3.msra.mxu0 %v2717_v55 }
 0x4f2   :  { %2273 = vmatprep.subr.mxu0 %v2731_v57 }
 0x4f3   :  { %2274 = vmatpush3.msra.mxu0 %v2731_v57 }
 0x5a4   :  { %v2251_v22 = vpop.f32.mrf.mxu0 }
 0x5a5   :  { %v1013_v23 = vadd.f32 %v2251_v22, %v2232_v21 }
 0x5a6   :  { %v1007_v25 = vpop.f32.mrf.mxu0 }
 0x5a7   :  { %2404 = vtanh.f32 %v1013_v23  ;;  %v1008_v26 = vadd.f32 %v1007_v25, %v926_v24 }
 0x5a9   :  { %2406 = vtanh.f32 %v1008_v26 }
 0x5b4   :  { %v2405_v27 = vpop.eup %2404 }
 0x5b5   :  { %2252 = vmatprep.subr.mxu1 %v2405_v27 }
 0x5b6   :  { %v2407_v28 = vpop.eup %2406  ;;  %2253 = vmatpush3.msra.mxu1 %v2405_v27 }
 0x5b7   :  { %2254 = vmatprep.subr.mxu1 %v2407_v28  ;;  %2275 = vmatprep.mubr.msk.f32.mxu0 %vm375_vm13, %v2407_v28 }
 0x5b8   :  { %2255 = vmatpush3.msra.mxu1 %v2407_v28  ;;  %2276 = vmatmul.mubr.msk.f32.vlgmr.msra.gmra.mxu0 %vm375_vm13, %v2405_v27 }
 0x5b9   :  { %2257 = vmatmul.mubr.msk.f32.vlgmr.msra.gmra.mxu1 %vm293_vm12, %v2661_v47  ;;  %2278 = vmatprep.subr.mxu1 %v2622_v38 }
 0x5ba   :  { %2279 = vmatpush3.msra.mxu1 %v2622_v38  ;;  %2301 = vmatprep.mubr.msk.f32.mxu0 %vm293_vm12, %v2650_v44  ;;  %v1603_v44 = vld [vmem:[%s3005_s9 + $0x30] sm:$0xff] }
 0x5bb   :  { %2280 = vmatprep.subr.mxu1 %v2629_v39 }
 0x5bc   :  { %2281 = vmatpush3.msra.mxu1 %v2629_v39 }
 0x5bd   :  { %2282 = vmatprep.subr.mxu1 %v2636_v40 }
 0x5be   :  { %2283 = vmatpush3.msra.mxu1 %v2636_v40 }
 0x5bf   :  { %2284 = vmatprep.subr.mxu1 %v2643_v41 }
 0x5c0   :  { %2285 = vmatpush3.msra.mxu1 %v2643_v41 }
 0x5c1   :  { %2286 = vmatprep.subr.mxu1 %v2708_v54 }
 0x5c2   :  { %2287 = vmatpush3.msra.mxu1 %v2708_v54 }
 0x5c3   :  { %2288 = vmatprep.subr.mxu1 %v2722_v56 }
 0x5c4   :  { %2289 = vmatpush3.msra.mxu1 %v2722_v56 }
 0x5c5   :  { %2290 = vmatprep.subr.mxu1 %v2736_v58 }
 0x5c6   :  { %2291 = vmatpush3.msra.mxu1 %v2736_v58 }
 0x5c7   :  { %2292 = vmatprep.subr.mxu1 %v2745_v59 }
 0x5c8   :  { %2293 = vmatpush3.msra.mxu1 %v2745_v59 }
 0x5c9   :  { %2304 = vmatprep.subr.mxu1 %v2666_v48 }
 0x678   :  { %v2277_v31 = vpop.f32.mrf.mxu0 }
 0x679   :  { %v2258_v29 = vpop.f32.mrf.mxu1 }
 0x67a   :  { %v1165_v34 = vpop.f32.mrf.mxu0 }
 0x67b   :  { %v1084_v30 = vpop.f32.mrf.mxu1 }
 0x67c   :  { %2294 = vmatprep.mubr.msk.f32.mxu1 %vm375_vm13, %v1084_v30 }
 0x67d   :  { %2295 = vmatmul.mubr.msk.f32.vlgmr.msra.gmra.mxu1 %vm375_vm13, %v2258_v29 }
 0x67e   :  { %2305 = vmatpush3.msra.mxu1 %v2666_v48  ;;  %v1601_v48 = vld [vmem:[%s3005_s9 + $0x20] sm:$0xff] }
 0x67f   :  { %2306 = vmatprep.subr.mxu1 %v2671_v49 }
 0x680   :  { %2307 = vmatpush3.msra.mxu1 %v2671_v49  ;;  %v1499_v49 = vld [vmem:[%s3004_s8 + $0x18] sm:$0xff] }
 0x681   :  { %2308 = vmatprep.subr.mxu1 %v2680_v50 }
 0x682   :  { %2309 = vmatpush3.msra.mxu1 %v2680_v50  ;;  %v1600_v50 = vld [vmem:[%s3005_s9 + $0x18] sm:$0xff] }
 0x683   :  { %2310 = vmatprep.subr.mxu1 %v2687_v51 }
 0x684   :  { %2311 = vmatpush3.msra.mxu1 %v2687_v51  ;;  %v1498_v51 = vld [vmem:[%s3004_s8 + $0x10] sm:$0xff] }
 0x685   :  { %2312 = vmatprep.subr.mxu1 %v2694_v52 }
 0x686   :  { %2313 = vmatpush3.msra.mxu1 %v2694_v52  ;;  %v1599_v52 = vld [vmem:[%s3005_s9 + $0x10] sm:$0xff] }
 0x687   :  { %2314 = vmatprep.subr.mxu1 %v2703_v53 }
 0x688   :  { %2315 = vmatpush3.msra.mxu1 %v2703_v53  ;;  %v1497_v53 = vld [vmem:[%s3004_s8 + $0x8] sm:$0xff] }
 0x689   :  { %2316 = vmatprep.subr.mxu1 %v2717_v55 }
 0x68a   :  { %2317 = vmatpush3.msra.mxu1 %v2717_v55  ;;  %v1496_v55 = vld [vmem:[%s3004_s8] sm:$0xff] }
 0x68b   :  { %2318 = vmatprep.subr.mxu1 %v2731_v57 }
 0x68c   :  { %2319 = vmatpush3.msra.mxu1 %v2731_v57 }
 0x73d   :  { %v2296_v32 = vpop.f32.mrf.mxu1 }
 0x73e   :  { %v1252_v33 = vadd.f32 %v2296_v32, %v2277_v31  ;;  %v1844_v32 = vld [vmem:[%s3008_s12] sm:$0x1]  ;;  %s2440_s12 = scalar_lea.vmem %s1866_s30, 16 }
 0x73f   :  { %v1246_v35 = vpop.f32.mrf.mxu1  ;;  %p2441_p5 = scmp.ne.s32.totalorder %s1866_s30, %s2440_s12  ;;  %p2446_p7 = scmp.lt.s32.totalorder %s2444_s14, %s2440_s12 }
 0x740   :  { %2408 = vtanh.f32 %v1252_v33  ;;  %v1247_v36 = vadd.f32 %v1246_v35, %v1165_v34 }
 0x741   :  { %p2447_p8 = por %p2446_p7, %p2445_p6 }
 0x742   :  { %2410 = vtanh.f32 %v1247_v36 }
 0x743   :  { %p2448_p9 = pnand %p2447_p8, %p2441_p5 }
 0x74d   :  { %v2409_v37 = vpop.eup %2408 }
 0x74e   :  { %2297 = vmatprep.subr.mxu0 %v2409_v37 }
 0x74f   :  { %v2411_v42 = vpop.eup %2410  ;;  %2298 = vmatpush3.msra.mxu0 %v2409_v37 }
 0x750   :  { %2299 = vmatprep.subr.mxu0 %v2411_v42  ;;  %2320 = vmatprep.mubr.msk.f32.mxu1 %vm375_vm13, %v2411_v42 }
 0x751   :  { %2300 = vmatpush3.msra.mxu0 %v2411_v42  ;;  %2321 = vmatmul.mubr.msk.f32.vlgmr.msra.gmra.mxu1 %vm375_vm13, %v2409_v37 }
 0x752   :  { %2302 = vmatmul.mubr.msk.f32.vlgmr.msra.gmra.mxu0 %vm293_vm12, %v2661_v47  ;;  %2323 = vmatprep.subr.mxu0 %v2622_v38  ;;  %v1500_v47 = vld [vmem:[%s3004_s8 + $0x20] sm:$0xff] }
 0x753   :  { %2324 = vmatpush3.msra.mxu0 %v2622_v38 }
 0x754   :  { %2325 = vmatprep.subr.mxu0 %v2629_v39 }
 0x755   :  { %2326 = vmatpush3.msra.mxu0 %v2629_v39 }
 0x756   :  { %2327 = vmatprep.subr.mxu0 %v2636_v40 }
 0x757   :  { %2328 = vmatpush3.msra.mxu0 %v2636_v40  ;;  %v1503_v40 = vld [vmem:[%s3004_s8 + $0x38] sm:$0xff] }
 0x758   :  { %2329 = vmatprep.subr.mxu0 %v2643_v41  ;;  %2342 = vmatprep.subr.mxu1 %v1503_v40 }
 0x759   :  { %2330 = vmatpush3.msra.mxu0 %v2643_v41  ;;  %v1604_v41 = vld [vmem:[%s3005_s9 + $0x38] sm:$0xff]  ;;  %2343 = vmatpush3.msra.mxu1 %v1503_v40 }
 0x75a   :  { %2331 = vmatprep.subr.mxu0 %v2708_v54  ;;  %2344 = vmatprep.subr.mxu1 %v1502_v43 }
 0x75b   :  { %2332 = vmatpush3.msra.mxu0 %v2708_v54  ;;  %2345 = vmatpush3.msra.mxu1 %v1502_v43  ;;  %v1598_v54 = vld [vmem:[%s3005_s9 + $0x8] sm:$0xff] }
 0x75c   :  { %2333 = vmatprep.subr.mxu0 %v2722_v56  ;;  %2346 = vmatprep.subr.mxu1 %v1501_v45 }
 0x75d   :  { %2334 = vmatpush3.msra.mxu0 %v2722_v56  ;;  %2347 = vmatpush3.msra.mxu1 %v1501_v45  ;;  %v1597_v56 = vld [vmem:[%s3005_s9] sm:$0xff] }
 0x75e   :  { %2335 = vmatprep.subr.mxu0 %v2736_v58  ;;  %2348 = vmatprep.subr.mxu1 %v1500_v47 }
 0x75f   :  { %2336 = vmatpush3.msra.mxu0 %v2736_v58  ;;  %2349 = vmatpush3.msra.mxu1 %v1500_v47 }
 0x760   :  { %2337 = vmatprep.subr.mxu0 %v2745_v59  ;;  %2350 = vmatprep.subr.mxu1 %v1499_v49 }
 0x761   :  { %2338 = vmatpush3.msra.mxu0 %v2745_v59  ;;  %2351 = vmatpush3.msra.mxu1 %v1499_v49 }
 0x762   :  { %2361 = vmatprep.subr.mxu0 %v1604_v41  ;;  %2352 = vmatprep.subr.mxu1 %v1498_v51 }
 0x763   :  { %2353 = vmatpush3.msra.mxu1 %v1498_v51 }
 0x764   :  { %2354 = vmatprep.subr.mxu1 %v1497_v53 }
 0x765   :  { %2355 = vmatpush3.msra.mxu1 %v1497_v53 }
 0x766   :  { %2356 = vmatprep.subr.mxu1 %v1496_v55 }
 0x767   :  { %2357 = vmatpush3.msra.mxu1 %v1496_v55 }
 0x768   :  { %2380 = vmatprep.subr.mxu1 %v2465_v2 }
 0x811   :  { %v2322_v57 = vpop.f32.mrf.mxu1 }
 0x812   :  { %v2303_v38 = vpop.f32.mrf.mxu0 }
 0x813   :  { %v1404_v59 = vpop.f32.mrf.mxu1 }
 0x814   :  { %v1323_v39 = vpop.f32.mrf.mxu0 }
 0x815   :  { %2339 = vmatprep.mubr.msk.f32.mxu0 %vm375_vm13, %v1323_v39 }
 0x816   :  { %2340 = vmatmul.mubr.msk.f32.vlgmr.msra.gmra.mxu0 %vm375_vm13, %v2303_v38 }
 0x817   :  { %2362 = vmatpush3.msra.mxu0 %v1604_v41 }
 0x818   :  { %2363 = vmatprep.subr.mxu0 %v1603_v44 }
 0x819   :  { %2364 = vmatpush3.msra.mxu0 %v1603_v44 }
 0x81a   :  { %2365 = vmatprep.subr.mxu0 %v1602_v46 }
 0x81b   :  { %2366 = vmatpush3.msra.mxu0 %v1602_v46 }
 0x81c   :  { %2367 = vmatprep.subr.mxu0 %v1601_v48 }
 0x81d   :  { %2368 = vmatpush3.msra.mxu0 %v1601_v48 }
 0x81e   :  { %2369 = vmatprep.subr.mxu0 %v1600_v50 }
 0x81f   :  { %2370 = vmatpush3.msra.mxu0 %v1600_v50 }
 0x820   :  { %2371 = vmatprep.subr.mxu0 %v1599_v52 }
 0x821   :  { %2372 = vmatpush3.msra.mxu0 %v1599_v52 }
 0x822   :  { %2373 = vmatprep.subr.mxu0 %v1598_v54 }
 0x823   :  { %2374 = vmatpush3.msra.mxu0 %v1598_v54 }
 0x824   :  { %2375 = vmatprep.subr.mxu0 %v1597_v56 }
 0x825   :  { %2376 = vmatpush3.msra.mxu0 %v1597_v56 }
 0x826   :  { %2385 = vmatprep.subr.mxu0 %v2465_v2 }
 0x8d6   :  { %v2341_v58 = vpop.f32.mrf.mxu0 }
 0x8d7   :  { %v1491_v61 = vadd.f32 %v2341_v58, %v2322_v57 }
 0x8d8   :  { %v1485_v62 = vpop.f32.mrf.mxu0 }
 0x8d9   :  { %v1486_v63 = vadd.f32 %v1485_v62, %v1404_v59 }
 0x8db   :  { %2412 = vtanh.f32 %v1486_v63 }
 0x8dc   :  { %2414 = vtanh.f32 %v1491_v61 }
 0x8e8   :  { %v2413_v0 = vpop.eup %2412 }
 0x8e9   :  { %v2415_v3 = vpop.eup %2414  ;;  %2358 = vmatprep.mubr.msk.f32.mxu1 %vm375_vm13, %v2413_v0  ;;  %2377 = vmatprep.mubr.msk.f32.mxu0 %vm375_vm13, %v2413_v0 }
 0x8ea   :  { %2359 = vmatmul.mubr.msk.f32.vlgmr.msra.gmra.mxu1 %vm375_vm13, %v2415_v3  ;;  %2378 = vmatmul.mubr.msk.f32.vlgmr.msra.gmra.mxu0 %vm375_vm13, %v2415_v3 }
 0x8eb   :  { %2386 = vmatpush3.msra.mxu0 %v1693_v1  ;;  %2389 = vmatprep.mubr.msk.f32.mxu0 %vm2466_vm1, %v2465_v2 }
 0x8ec   :  { %2387 = vmatprep.subr.mxu0 %v2465_v2  ;;  %2382 = vmatprep.mubr.msk.f32.mxu1 %vm2466_vm1, %v2465_v2 }
 0x8ed   :  { %2388 = vmatpush3.msra.mxu0 %v1692_v5  ;;  %2381 = vmatpush3.msk.msra.mxu1 %vm119_vm0, %v1694_v7 }
 0x8ee   :  { %2390 = vmatmul.mubr.msk.f32.vlgmr.msra.gmra.mxu0 %vm293_vm12, %v270_v6 }
 0x9aa   :  { %v2360_v8 = vpop.f32.mrf.mxu1  ;;  %v2379_v9 = vpop.f32.mrf.mxu0 }
 0x9ab   :  { %v1925_v10 = vmul.f32 -1.442695, %v2360_v8 }
 0x9ac   :  { %v1576_v11 = vpop.f32.mrf.mxu1  ;;  %v1671_v12 = vpop.f32.mrf.mxu0 }
 0x9ad   :  { %2416 = vpow2.f32 %v1925_v10  ;;  %v1924_v60 = vmul.f32 -1.442695, %v1576_v11 }
 0x9ae   :  { %v1840_v13 = vpop.f32.mrf.mxu0 }
 0x9af   :  { %2418 = vpow2.f32 %v1924_v60 }
 0x9b0   :  { %v2391_v14 = vpop.f32.mrf.mxu0 }
 0x9ba   :  { %v2417_v2 = vpop.eup %2416 }
 0x9bb   :  { %v1592_v15 = vadd.f32 1.0, %v2417_v2 }
 0x9bc   :  { %v2419_v16 = vpop.eup %2418 }
 0x9bd   :  { %2420 = vrcp.f32 %v1592_v15  ;;  %v1591_v17 = vadd.f32 1.0, %v2419_v16 }
 0x9bf   :  { %2422 = vrcp.f32 %v1591_v17 }
 0x9ca   :  { %v2421_v18 = vpop.eup %2420 }
 0x9cb   :  { %v1681_v19 = vmul.f32 %v2421_v18, %v2379_v9 }
 0x9cc   :  { %v2423_v20 = vpop.eup %2422 }
 0x9cd   :  { %v1680_v21 = vmul.f32 %v2423_v20, %v1671_v12  ;;  %v1684_v22 = vsel %vm1682_vm14, %v1681_v19, 0.0 }
 0x9cf   :  { %v1683_v23 = vsel %vm1682_vm14, %v1680_v21, 0.0 }
 0x9d0   :  { %v1685_v24 = vadd.f32 %v1684_v22, %v1683_v23 }
 0x9d2   :  { %v1686_v25 = vrot.slane %v1685_v24, 4 }
 0x9d4   :  { %v1687_v26 = vadd.f32 %v1686_v25, %v1685_v24 }
 0x9d6   :  { %v1688_v27 = vrot.slane %v1687_v26, 2 }
 0x9d8   :  { %v1689_v28 = vadd.f32 %v1688_v27, %v1687_v26 }
 0x9da   :  { %v1690_v29 = vrot.slane %v1689_v28, 1 }
 0x9dc   :  { %v1691_v30 = vadd.f32 %v1690_v29, %v1689_v28 }
 0x9de   :  { %2383 = vmatmul.mubr.msk.f32.vlgmr.msra.gmra.mxu1 %vm1682_vm14, %v1691_v30 }
 0xa9e   :  { %v1767_v31 = vpop.f32.mrf.mxu1 }
 0xa9f   :  { %v1841_v33 = vadd.f32 %v1840_v13, %v1767_v31 }
 0xaa0   :  { %v2384_v34 = vpop.f32.mrf.mxu1 }
 0xaa1   :  { %v1845_v35 = vadd.f32 %v1844_v32, %v1841_v33 }
 0xaa3   :  { %v1847_v36 = vsel %vm1846_vm15, %v1845_v35, -inf }
 0xaa4   :  { %1848 = vmax.xlane.f32.xlu0 %v1847_v36 }
 0xb2d   :  { %v1849_v37 = vpop.xlane.xlu0 %1848 }
 0xb2e   :  { %v1850_v42 = vsub.f32 %v1845_v35, %v1849_v37 }
 0xb30   :  { %v1851_v38 = vmul.f32 1.442695, %v1850_v42 }
 0xb32   :  { %2424 = vpow2.f32 %v1851_v38 }
 0xb3f   :  { %v2425_v39 = vpop.eup %2424 }
 0xb40   :  { %v1853_v40 = vsel %vm1846_vm15, %v2425_v39, 0.0 }
 0xb41   :  { %1854 = vadd.xlane.f32.xlu0 %v1853_v40 }
 0xbca   :  { %v1855_v41 = vpop.xlane.xlu0 %1854 }
 0xbcb   :  { %2426 = vrcp.f32 %v1855_v41 }
 0xbd8   :  { %v2427_v43 = vpop.eup %2426 }
 0xbd9   :  { %v1857_v44 = vmul.f32 %v2427_v43, %v2425_v39 }
 0xbdb   :  { %1858 = vst [vmem:[#allocation5] sm:$0x1] %v1857_v44 }
 0xbdc   :  { %2451 = shalt.err (!%p2448_p9)
}
 0xbdd   :  { %1868 = dma.vmem_to_hbm [thread:$0]  %s1866_s30, 16, %s3009_s13, [#allocation3]  }
 0xbde   :  { %2462 = dma.done.wait [#allocation3], 16  }
 0xbdf   :  { %2463 = vsyncadd [#allocation3], 4294967280 }
 0xbe0   :  { %1872 = vsyncpa [#allocation3], 1 }
 0xbe1   :  { %1873 = vsyncpa [#allocation4], 1 }

</bundles_post_ra>
